<compile_context>
chip_gen: v5e
topology: v5e:2x2
jax: 0.10.0
libtpu: 0.0.40
codegen_flags: <defaults>
</compile_context>

<pallas_src>
import functools

import jax
import jax.numpy as jnp
from jax.experimental import pallas as pl
from jax.experimental.pallas import tpu as pltpu


def _round_up(x, m):
    return ((x + m - 1) // m) * m


# ----------------------------------------------------------------------------
# Pallas kernel: fused projection + MLP head
#   pooled_ref : [TB, K0p]   bf16   (zero-padded pooled stats)
#   proj_ref   : [K0p, 768]  bf16   (placeholder-backbone projection)
#   w1_ref     : [768, 256]  bf16
#   b1_ref     : [1, 256]    f32
#   w2_ref     : [256, 128]  bf16   (zero-padded from [256, 2])
#   b2_ref     : [1, 128]    f32    (zero-padded from [1, 2])
#   o_ref      : [TB, 128]   f32    (lane-dense; logits live in [:, :2])
# ----------------------------------------------------------------------------
def fused_head_kernel(pooled_ref, proj_ref, w1_ref, b1_ref, w2_ref, b2_ref, o_ref):
    # Backbone-placeholder projection (fused; feature never leaves VMEM).
    feat = jnp.dot(pooled_ref[...], proj_ref[...],
                   preferred_element_type=jnp.float32)          # [TB, 768] f32

    # Linear(768, 256) + bias + ReLU (elementwise kept in f32 for v5e).
    h = jnp.dot(feat.astype(jnp.bfloat16), w1_ref[...],
                preferred_element_type=jnp.float32) + b1_ref[...]
    h = jnp.maximum(h, 0.0)

    # Dropout(p=0.2): identity in eval mode.

    # Linear(256, 2) padded to a lane-dense 128-wide output.
    out = jnp.dot(h.astype(jnp.bfloat16), w2_ref[...],
                  preferred_element_type=jnp.float32) + b2_ref[...]
    o_ref[...] = out


def mcbo_head(pooled, proj, w1, b1, w2, b2, *, tb_max=512):
    """pooled: [B, K0] f32, proj: [K0, 768], w1: [768,256], b1: [1,256],
       w2: [256,2], b2: [1,2]  ->  logits [B, 2] f32."""
    B, K0 = pooled.shape

    # Lane/sublane-dense padding.
    K0p = _round_up(K0, 128)              # contraction dim of the fused proj matmul
    TB = min(tb_max, _round_up(B, 16))    # bf16 sublane packing = 16 rows
    Bp = _round_up(B, TB)

    pooled_p = jnp.zeros((Bp, K0p), jnp.bfloat16).at[:B, :K0].set(
        pooled.astype(jnp.bfloat16))
    proj_p = jnp.zeros((K0p, 768), jnp.bfloat16).at[:K0, :].set(
        proj.astype(jnp.bfloat16))
    w1_bf = w1.astype(jnp.bfloat16)
    w2_p = jnp.zeros((256, 128), jnp.bfloat16).at[:, :2].set(w2.astype(jnp.bfloat16))
    b1_f = b1.reshape(1, 256).astype(jnp.float32)
    b2_p = jnp.zeros((1, 128), jnp.float32).at[:, :2].set(
        b2.reshape(1, 2).astype(jnp.float32))

    grid = (Bp // TB,)
    out_p = pl.pallas_call(
        fused_head_kernel,
        out_shape=jax.ShapeDtypeStruct((Bp, 128), jnp.float32),
        grid_spec=pltpu.PrefetchScalarGridSpec(
            num_scalar_prefetch=0,
            grid=grid,
            in_specs=[
                pl.BlockSpec((TB, K0p), lambda i: (i, 0)),   # pooled tile
                pl.BlockSpec((K0p, 768), lambda i: (0, 0)),  # proj   (resident)
                pl.BlockSpec((768, 256), lambda i: (0, 0)),  # w1     (resident)
                pl.BlockSpec((1, 256), lambda i: (0, 0)),    # b1     (resident)
                pl.BlockSpec((256, 128), lambda i: (0, 0)),  # w2 pad (resident)
                pl.BlockSpec((1, 128), lambda i: (0, 0)),    # b2 pad (resident)
            ],
            out_specs=pl.BlockSpec((TB, 128), lambda i: (i, 0)),
        ),
        compiler_params=pltpu.CompilerParams(
            dimension_semantics=("parallel",)),
    )(pooled_p, proj_p, w1_bf, b1_f, w2_p, b2_p)

    return out_p[:B, :2]


# ----------------------------------------------------------------------------
# Plain-JAX glue: pooled image statistics feeding the placeholder projection.
# ----------------------------------------------------------------------------
def pooled_stats(left_nchw, right_nchw):
    lp = jnp.mean(left_nchw, axis=(2, 3))      # [B, C]
    rp = jnp.mean(right_nchw, axis=(2, 3))     # [B, C]
    return jnp.concatenate([lp, rp], axis=-1)  # [B, 2C]


@functools.partial(jax.jit, static_argnames=())
def mcbo_forward(left_tensor, right_tensor, params):
    pooled = pooled_stats(left_tensor, right_tensor)
    return mcbo_head(pooled, params["proj"], params["w1"], params["b1"],
                     params["w2"], params["b2"])


# ----------------------------------------------------------------------------
# Deterministic parameter construction (synthetic; no checkpoint load).
# ----------------------------------------------------------------------------
def make_params(key, in_channels):
    k0, k1, k2, k3, k4 = jax.random.split(key, 5)
    proj = jax.random.normal(k0, (2 * in_channels, 768), jnp.float32) * 0.05
    w1 = jax.random.normal(k1, (768, 256), jnp.float32) * (1.0 / jnp.sqrt(768.0))
    b1 = jax.random.normal(k2, (1, 256), jnp.float32) * 0.01
    w2 = jax.random.normal(k3, (256, 2), jnp.float32) * (1.0 / jnp.sqrt(256.0))
    b2 = jax.random.normal(k4, (1, 2), jnp.float32) * 0.01
    return {"proj": proj, "w1": w1, "b1": b1, "w2": w2, "b2": b2}


# ----------------------------------------------------------------------------
# Reference (plain JAX) with the same bf16 operand casting as the kernel.
# ----------------------------------------------------------------------------
def reference_forward(left, right, params):
    pooled = pooled_stats(left, right)
    feat = jnp.dot(pooled.astype(jnp.bfloat16), params["proj"].astype(jnp.bfloat16),
                   preferred_element_type=jnp.float32)
    h = jnp.dot(feat.astype(jnp.bfloat16), params["w1"].astype(jnp.bfloat16),
                preferred_element_type=jnp.float32) + params["b1"]
    h = jnp.maximum(h, 0.0)
    return jnp.dot(h.astype(jnp.bfloat16), params["w2"].astype(jnp.bfloat16),
                   preferred_element_type=jnp.float32) + params["b2"]


if __name__ == "__main__":
    key = jax.random.PRNGKey(0)
    k_in, k_l, k_r = jax.random.split(key, 3)

    B, C, H, W = 2, 3, 16, 16            # small NCHW image pair
    params = make_params(k_in, C)
    left = jax.random.normal(k_l, (B, C, H, W), jnp.float32)
    right = jax.random.normal(k_r, (B, C, H, W), jnp.float32)

    out = mcbo_forward(left, right, params)
    jax.block_until_ready(out)

    ref = reference_forward(left, right, params)
    assert out.shape == (B, 2)
    assert jnp.allclose(out, ref, atol=1e-3, rtol=1e-3), (
        f"max abs err = {jnp.max(jnp.abs(out - ref))}")

    print("KERNEL_OK")
</pallas_src>

<mosaic_0001>
module attributes {stable_mosaic.version = 11 : i64} {
  func.func @fused_head_kernel(%arg0: i32, %arg1: memref<16x128xbf16, #tpu.memory_space<vmem>>, %arg2: memref<128x768xbf16, #tpu.memory_space<vmem>>, %arg3: memref<768x256xbf16, #tpu.memory_space<vmem>>, %arg4: memref<1x256xf32, #tpu.memory_space<vmem>>, %arg5: memref<256x128xbf16, #tpu.memory_space<vmem>>, %arg6: memref<1x128xf32, #tpu.memory_space<vmem>>, %arg7: memref<16x128xf32, #tpu.memory_space<vmem>>) attributes {dimension_semantics = [#tpu.dimension_semantics<parallel>], iteration_bounds = array<i64: 1>, scalar_prefetch = 0 : i64, scratch_operands = 0 : i64, tpu.core_type = #tpu.core_type<tc>, window_params = [{transform_indices = @transform_0, window_bounds = array<i64: 16, 128>}, {pipeline_mode = #tpu.pipeline_mode<synchronous>, transform_indices = @transform_1, window_bounds = array<i64: 128, 768>}, {pipeline_mode = #tpu.pipeline_mode<synchronous>, transform_indices = @transform_2, window_bounds = array<i64: 768, 256>}, {pipeline_mode = #tpu.pipeline_mode<synchronous>, transform_indices = @transform_3, window_bounds = array<i64: 1, 256>}, {pipeline_mode = #tpu.pipeline_mode<synchronous>, transform_indices = @transform_4, window_bounds = array<i64: 256, 128>}, {pipeline_mode = #tpu.pipeline_mode<synchronous>, transform_indices = @transform_5, window_bounds = array<i64: 1, 128>}, {transform_indices = @transform_6, window_bounds = array<i64: 16, 128>}]} {
    %c0 = arith.constant 0 : index
    %c0_0 = arith.constant 0 : index
    %0 = vector.load %arg1[%c0, %c0_0] : memref<16x128xbf16, #tpu.memory_space<vmem>>, vector<16x128xbf16>
    %c0_1 = arith.constant 0 : index
    %c0_2 = arith.constant 0 : index
    %1 = vector.load %arg2[%c0_1, %c0_2] : memref<128x768xbf16, #tpu.memory_space<vmem>>, vector<128x768xbf16>
    %cst = arith.constant dense<0.000000e+00> : vector<16x768xf32>
    %2 = tpu.matmul %0, %1, %cst {dimension_numbers = #tpu.dot_dimension_numbers<[1], [0], [0], [1], [0, 0, 1, 1], [], []>} : vector<16x128xbf16>, vector<128x768xbf16>, vector<16x768xf32> -> vector<16x768xf32>
    %3 = arith.truncf %2 : vector<16x768xf32> to vector<16x768xbf16>
    %c0_3 = arith.constant 0 : index
    %c0_4 = arith.constant 0 : index
    %4 = vector.load %arg3[%c0_3, %c0_4] : memref<768x256xbf16, #tpu.memory_space<vmem>>, vector<768x256xbf16>
    %cst_5 = arith.constant dense<0.000000e+00> : vector<16x256xf32>
    %5 = tpu.matmul %3, %4, %cst_5 {dimension_numbers = #tpu.dot_dimension_numbers<[1], [0], [0], [1], [0, 0, 1, 1], [], []>} : vector<16x768xbf16>, vector<768x256xbf16>, vector<16x256xf32> -> vector<16x256xf32>
    %c0_6 = arith.constant 0 : index
    %c0_7 = arith.constant 0 : index
    %6 = vector.load %arg4[%c0_6, %c0_7] : memref<1x256xf32, #tpu.memory_space<vmem>>, vector<1x256xf32>
    %7 = vector.broadcast %6 : vector<1x256xf32> to vector<16x256xf32>
    %8 = arith.addf %5, %7 : vector<16x256xf32>
    %cst_8 = arith.constant 0.000000e+00 : f32
    %9 = vector.broadcast %cst_8 : f32 to vector<16x256xf32>
    %10 = arith.maximumf %8, %9 : vector<16x256xf32>
    %11 = arith.truncf %10 : vector<16x256xf32> to vector<16x256xbf16>
    %c0_9 = arith.constant 0 : index
    %c0_10 = arith.constant 0 : index
    %12 = vector.load %arg5[%c0_9, %c0_10] : memref<256x128xbf16, #tpu.memory_space<vmem>>, vector<256x128xbf16>
    %cst_11 = arith.constant dense<0.000000e+00> : vector<16x128xf32>
    %13 = tpu.matmul %11, %12, %cst_11 {dimension_numbers = #tpu.dot_dimension_numbers<[1], [0], [0], [1], [0, 0, 1, 1], [], []>} : vector<16x256xbf16>, vector<256x128xbf16>, vector<16x128xf32> -> vector<16x128xf32>
    %c0_12 = arith.constant 0 : index
    %c0_13 = arith.constant 0 : index
    %14 = vector.load %arg6[%c0_12, %c0_13] : memref<1x128xf32, #tpu.memory_space<vmem>>, vector<1x128xf32>
    %15 = vector.broadcast %14 : vector<1x128xf32> to vector<16x128xf32>
    %16 = arith.addf %13, %15 : vector<16x128xf32>
    %c0_14 = arith.constant 0 : index
    %c0_15 = arith.constant 0 : index
    %17 = vector.load %arg7[%c0_14, %c0_15] : memref<16x128xf32, #tpu.memory_space<vmem>>, vector<16x128xf32>
    tpu.vector_store %arg7[%c0_14, %c0_15], %16 {strides = array<i32>} : memref<16x128xf32, #tpu.memory_space<vmem>>, vector<16x128xf32>,
    return
  }
  func.func @transform_0(%arg0: i32) -> (i32, i32) {
    %c0_i32 = arith.constant 0 : i32
    %c0_i32_0 = arith.constant 0 : i32
    return %arg0, %c0_i32 : i32, i32
  }
  func.func @transform_1(%arg0: i32) -> (i32, i32) {
    %c0_i32 = arith.constant 0 : i32
    %c0_i32_0 = arith.constant 0 : i32
    %c0_i32_1 = arith.constant 0 : i32
    return %c0_i32, %c0_i32_0 : i32, i32
  }
  func.func @transform_2(%arg0: i32) -> (i32, i32) {
    %c0_i32 = arith.constant 0 : i32
    %c0_i32_0 = arith.constant 0 : i32
    %c0_i32_1 = arith.constant 0 : i32
    return %c0_i32, %c0_i32_0 : i32, i32
  }
  func.func @transform_3(%arg0: i32) -> (i32, i32) {
    %c0_i32 = arith.constant 0 : i32
    %c0_i32_0 = arith.constant 0 : i32
    %c0_i32_1 = arith.constant 0 : i32
    return %c0_i32, %c0_i32_0 : i32, i32
  }
  func.func @transform_4(%arg0: i32) -> (i32, i32) {
    %c0_i32 = arith.constant 0 : i32
    %c0_i32_0 = arith.constant 0 : i32
    %c0_i32_1 = arith.constant 0 : i32
    return %c0_i32, %c0_i32_0 : i32, i32
  }
  func.func @transform_5(%arg0: i32) -> (i32, i32) {
    %c0_i32 = arith.constant 0 : i32
    %c0_i32_0 = arith.constant 0 : i32
    %c0_i32_1 = arith.constant 0 : i32
    return %c0_i32, %c0_i32_0 : i32, i32
  }
  func.func @transform_6(%arg0: i32) -> (i32, i32) {
    %c0_i32 = arith.constant 0 : i32
    %c0_i32_0 = arith.constant 0 : i32
    return %arg0, %c0_i32 : i32, i32
  }
}

</mosaic_0001>

<bundles_post_ra>
// kernel: mcbo_forward.1
= control target key start
LH: loop header
LB: loop body
LE: loop exit
PB: predicated region body
PF: predicated region fallthrough
CT: control target
= control target key end

     0   :  { %s3123_s1 = inlined_call_operand.vmem [shape: bf16[128,768], index: 1, kind: input, shape index: {}]   ;;  %s3124_s0 = inlined_call_operand.vmem [shape: bf16[16,128], index: 0, kind: input, shape index: {}]   ;;  %s3125_s2 = inlined_call_operand.vmem [shape: bf16[768,256], index: 2, kind: input, shape index: {}]   ;;  %s3126_s5 = inlined_call_operand.vmem [shape: f32[1,128], index: 5, kind: input, shape index: {}]   ;;  %s3127_s4 = inlined_call_operand.vmem [shape: bf16[256,128], index: 4, kind: input, shape index: {}]   ;;  %s3128_s3 = inlined_call_operand.vmem [shape: f32[1,256], index: 3, kind: input, shape index: {}]   ;;  %s3129_s6 = inlined_call_operand.vmem [shape: f32[16,128], index: 6, kind: output, shape index: {}]  }
   0x1   :  { %v1505_v0 = vld [vmem:[%s3123_s1 + $0x150] sm:$0xf]  ;;  %v2021_v1 = vld [vmem:[%s3123_s1 + $0x164] sm:$0xf0]  ;;  %v2018_v2 = vld [vmem:[%s3123_s1 + $0x154] sm:$0xf] }
   0x2   :  { %v1506_v3 = vor.u32 %v2021_v1, %v1505_v0  ;;  %v1507_v4 = vld [vmem:[%s3123_s1 + $0x168] sm:$0xf0]  ;;  %v1513_v5 = vld [vmem:[%s3123_s1 + $0x158] sm:$0xf]  ;;  %v2022_v6 = vld [vmem:[%s3123_s1 + $0x16c] sm:$0xf0] }
   0x3   :  { %v1510_v7 = vor.u32 %v2018_v2, %v1507_v4  ;;  %v1514_v8 = vor.u32 %v2022_v6, %v1513_v5  ;;  %v2019_v9 = vld [vmem:[%s3123_s1 + $0x15c] sm:$0xf]  ;;  %v1515_v10 = vld [vmem:[%s3123_s1 + $0x170] sm:$0xf0]  ;;  %v1481_v11 = vld [vmem:[%s3123_s1 + $0x120] sm:$0xf] }
   0x4   :  { %319 = vmatpush.bf16.msra.mxu0 %v1506_v3  ;;  %v1518_v12 = vor.u32 %v2019_v9, %v1515_v10  ;;  %v2015_v13 = vld [vmem:[%s3123_s1 + $0x134] sm:$0xf0]  ;;  %v2012_v14 = vld [vmem:[%s3123_s1 + $0x124] sm:$0xf]  ;;  %v1483_v15 = vld [vmem:[%s3123_s1 + $0x138] sm:$0xf0] }
   0x5   :  { %333 = vmatpush.bf16.msra.mxu1 %v1510_v7  ;;  %347 = vmatpush.bf16.msra.mxu2 %v1514_v8  ;;  %v1482_v16 = vor.u32 %v2015_v13, %v1481_v11  ;;  %v1486_v17 = vor.u32 %v2012_v14, %v1483_v15  ;;  %v1489_v18 = vld [vmem:[%s3123_s1 + $0x128] sm:$0xf]  ;;  %v2016_v19 = vld [vmem:[%s3123_s1 + $0x13c] sm:$0xf0]  ;;  %v2013_v20 = vld [vmem:[%s3123_s1 + $0x12c] sm:$0xf] }
   0x6   :  { %361 = vmatpush.bf16.msra.mxu3 %v1518_v12  ;;  %v1490_v21 = vor.u32 %v2016_v19, %v1489_v18  ;;  %v1491_v22 = vld [vmem:[%s3123_s1 + $0x140] sm:$0xf0]  ;;  %v1457_v23 = vld [vmem:[%s3123_s1 + $0xf0] sm:$0xf]  ;;  %v2009_v24 = vld [vmem:[%s3123_s1 + $0x104] sm:$0xf0] }
   0x7   :  { %v1494_v25 = vor.u32 %v2013_v20, %v1491_v22  ;;  %v2006_v26 = vld [vmem:[%s3123_s1 + $0xf4] sm:$0xf]  ;;  %v1459_v27 = vld [vmem:[%s3123_s1 + $0x108] sm:$0xf0]  ;;  %v1465_v28 = vld [vmem:[%s3123_s1 + $0xf8] sm:$0xf]  ;;  %v1458_v29 = vor.u32 %v2009_v24, %v1457_v23 }
   0x8   :  { %320 = vmatpush.bf16.msra.mxu0 %v1482_v16  ;;  %v2010_v30 = vld [vmem:[%s3123_s1 + $0x10c] sm:$0xf0]  ;;  %v2007_v31 = vld [vmem:[%s3123_s1 + $0xfc] sm:$0xf]  ;;  %v1467_v32 = vld [vmem:[%s3123_s1 + $0x110] sm:$0xf0]  ;;  %v1462_v33 = vor.u32 %v2006_v26, %v1459_v27 }
   0x9   :  { %334 = vmatpush.bf16.msra.mxu1 %v1486_v17  ;;  %348 = vmatpush.bf16.msra.mxu2 %v1490_v21  ;;  %v1466_v34 = vor.u32 %v2010_v30, %v1465_v28  ;;  %v1433_v35 = vld [vmem:[%s3123_s1 + $0xc0] sm:$0xf]  ;;  %v2003_v36 = vld [vmem:[%s3123_s1 + $0xd4] sm:$0xf0]  ;;  %v2000_v37 = vld [vmem:[%s3123_s1 + $0xc4] sm:$0xf]  ;;  %v1470_v38 = vor.u32 %v2007_v31, %v1467_v32 }
   0xa   :  { %362 = vmatpush.bf16.msra.mxu3 %v1494_v25  ;;  %v1435_v39 = vld [vmem:[%s3123_s1 + $0xd8] sm:$0xf0]  ;;  %v1441_v40 = vld [vmem:[%s3123_s1 + $0xc8] sm:$0xf]  ;;  %v2004_v41 = vld [vmem:[%s3123_s1 + $0xdc] sm:$0xf0]  ;;  %v1434_v44 = vor.u32 %v2003_v36, %v1433_v35 }
   0xb   :  { %v2001_v42 = vld [vmem:[%s3123_s1 + $0xcc] sm:$0xf]  ;;  %v1443_v43 = vld [vmem:[%s3123_s1 + $0xe0] sm:$0xf0]  ;;  %v1438_v45 = vor.u32 %v2000_v37, %v1435_v39  ;;  %v1442_v46 = vor.u32 %v2004_v41, %v1441_v40  ;;  %v1409_v47 = vld [vmem:[%s3123_s1 + $0x90] sm:$0xf] }
   0xc   :  { %321 = vmatpush.bf16.msra.mxu0 %v1458_v29  ;;  %v1997_v48 = vld [vmem:[%s3123_s1 + $0xa4] sm:$0xf0]  ;;  %v1994_v49 = vld [vmem:[%s3123_s1 + $0x94] sm:$0xf]  ;;  %v1446_v50 = vor.u32 %v2001_v42, %v1443_v43  ;;  %v1411_v51 = vld [vmem:[%s3123_s1 + $0xa8] sm:$0xf0] }
   0xd   :  { %335 = vmatpush.bf16.msra.mxu1 %v1462_v33  ;;  %349 = vmatpush.bf16.msra.mxu2 %v1466_v34  ;;  %v1417_v52 = vld [vmem:[%s3123_s1 + $0x98] sm:$0xf]  ;;  %v1998_v53 = vld [vmem:[%s3123_s1 + $0xac] sm:$0xf0]  ;;  %v1995_v54 = vld [vmem:[%s3123_s1 + $0x9c] sm:$0xf]  ;;  %v1410_v56 = vor.u32 %v1997_v48, %v1409_v47  ;;  %v1414_v57 = vor.u32 %v1994_v49, %v1411_v51 }
   0xe   :  { %363 = vmatpush.bf16.msra.mxu3 %v1470_v38  ;;  %v1419_v55 = vld [vmem:[%s3123_s1 + $0xb0] sm:$0xf0]  ;;  %v1418_v58 = vor.u32 %v1998_v53, %v1417_v52  ;;  %v1385_v59 = vld [vmem:[%s3123_s1 + $0x60] sm:$0xf]  ;;  %v1991_v60 = vld [vmem:[%s3123_s1 + $0x74] sm:$0xf0] }
   0xf   :  { %v1988_v61 = vld [vmem:[%s3123_s1 + $0x64] sm:$0xf]  ;;  %v1422_v62 = vor.u32 %v1995_v54, %v1419_v55  ;;  %v1387_v63 = vld [vmem:[%s3123_s1 + $0x78] sm:$0xf0]  ;;  %v1393_v0 = vld [vmem:[%s3123_s1 + $0x68] sm:$0xf]  ;;  %v1386_v4 = vor.u32 %v1991_v60, %v1385_v59 }
  0x10   :  { %322 = vmatpush.bf16.msra.mxu0 %v1434_v44  ;;  %v1992_v1 = vld [vmem:[%s3123_s1 + $0x7c] sm:$0xf0]  ;;  %v1989_v2 = vld [vmem:[%s3123_s1 + $0x6c] sm:$0xf]  ;;  %v1395_v3 = vld [vmem:[%s3123_s1 + $0x80] sm:$0xf0]  ;;  %v1390_v5 = vor.u32 %v1988_v61, %v1387_v63 }
  0x11   :  { %336 = vmatpush.bf16.msra.mxu1 %v1438_v45  ;;  %350 = vmatpush.bf16.msra.mxu2 %v1442_v46  ;;  %v1394_v6 = vor.u32 %v1992_v1, %v1393_v0  ;;  %v1361_v7 = vld [vmem:[%s3123_s1 + $0x30] sm:$0xf]  ;;  %v1985_v8 = vld [vmem:[%s3123_s1 + $0x44] sm:$0xf0]  ;;  %v1982_v9 = vld [vmem:[%s3123_s1 + $0x34] sm:$0xf]  ;;  %v1398_v10 = vor.u32 %v1989_v2, %v1395_v3 }
  0x12   :  { %364 = vmatpush.bf16.msra.mxu3 %v1446_v50  ;;  %v1363_v11 = vld [vmem:[%s3123_s1 + $0x48] sm:$0xf0]  ;;  %v1369_v12 = vld [vmem:[%s3123_s1 + $0x38] sm:$0xf]  ;;  %v1986_v13 = vld [vmem:[%s3123_s1 + $0x4c] sm:$0xf0]  ;;  %v1362_v16 = vor.u32 %v1985_v8, %v1361_v7 }
  0x13   :  { %v1983_v14 = vld [vmem:[%s3123_s1 + $0x3c] sm:$0xf]  ;;  %v1371_v15 = vld [vmem:[%s3123_s1 + $0x50] sm:$0xf0]  ;;  %v1337_v17 = vld [vmem:[%s3123_s1] sm:$0xf]  ;;  %v1366_v18 = vor.u32 %v1982_v9, %v1363_v11  ;;  %v1370_v19 = vor.u32 %v1986_v13, %v1369_v12 }
  0x14   :  { %323 = vmatpush.bf16.msra.mxu0 %v1410_v56  ;;  %v1979_v20 = vld [vmem:[%s3123_s1 + $0x14] sm:$0xf0]  ;;  %v1976_v21 = vld [vmem:[%s3123_s1 + $0x4] sm:$0xf]  ;;  %v1339_v22 = vld [vmem:[%s3123_s1 + $0x18] sm:$0xf0]  ;;  %v1374_v23 = vor.u32 %v1983_v14, %v1371_v15 }
  0x15   :  { %337 = vmatpush.bf16.msra.mxu1 %v1414_v57  ;;  %351 = vmatpush.bf16.msra.mxu2 %v1418_v58  ;;  %v1345_v24 = vld [vmem:[%s3123_s1 + $0x8] sm:$0xf]  ;;  %v1980_v25 = vld [vmem:[%s3123_s1 + $0x1c] sm:$0xf0]  ;;  %v1977_v26 = vld [vmem:[%s3123_s1 + $0xc] sm:$0xf]  ;;  %v1338_v30 = vor.u32 %v1979_v20, %v1337_v17  ;;  %v1342_v33 = vor.u32 %v1976_v21, %v1339_v22 }
  0x16   :  { %365 = vmatpush.bf16.msra.mxu3 %v1422_v62  ;;  %v1347_v27 = vld [vmem:[%s3123_s1 + $0x20] sm:$0xf0]  ;;  %v1521_v28 = vld [vmem:[%s3123_s1 + $0x160] sm:$0xf]  ;;  %v2023_v29 = vld [vmem:[%s3123_s1 + $0x174] sm:$0xf0]  ;;  %v1346_v34 = vor.u32 %v1980_v25, %v1345_v24 }
  0x17   :  { %v2020_v31 = vld [vmem:[%s3123_s1 + $0x164] sm:$0xf]  ;;  %v1523_v32 = vld [vmem:[%s3123_s1 + $0x178] sm:$0xf0]  ;;  %v1350_v35 = vor.u32 %v1977_v26, %v1347_v27  ;;  %v1522_v36 = vor.u32 %v2023_v29, %v1521_v28  ;;  %v1497_v39 = vld [vmem:[%s3123_s1 + $0x130] sm:$0xf] }
  0x18   :  { %324 = vmatpush.bf16.msra.mxu0 %v1386_v4  ;;  %v1526_v37 = vor.u32 %v2020_v31, %v1523_v32  ;;  %v2379_v38 = vld [vmem:[%s3124_s0] sm:$0xff]  ;;  %v2017_v40 = vld [vmem:[%s3123_s1 + $0x144] sm:$0xf0]  ;;  %v2014_v41 = vld [vmem:[%s3123_s1 + $0x134] sm:$0xf] }
  0x19   :  { %338 = vmatpush.bf16.msra.mxu1 %v1390_v5  ;;  %352 = vmatpush.bf16.msra.mxu2 %v1394_v6  ;;  %v1499_v42 = vld [vmem:[%s3123_s1 + $0x148] sm:$0xf0]  ;;  %v1498_v43 = vor.u32 %v2017_v40, %v1497_v39  ;;  %v1473_v45 = vld [vmem:[%s3123_s1 + $0x100] sm:$0xf]  ;;  %v2011_v46 = vld [vmem:[%s3123_s1 + $0x114] sm:$0xf0] }
  0x1a   :  { %366 = vmatpush.bf16.msra.mxu3 %v1398_v10  ;;  %v1502_v44 = vor.u32 %v2014_v41, %v1499_v42  ;;  %v2008_v47 = vld [vmem:[%s3123_s1 + $0x104] sm:$0xf]  ;;  %v1475_v48 = vld [vmem:[%s3123_s1 + $0x118] sm:$0xf0]  ;;  %v1585_v49 = vld [vmem:[%s3125_s2 + $0x70] sm:$0xf]  ;;  %v1474_v53 = vor.u32 %v2011_v46, %v1473_v45 }
  0x1b   :  { %v2039_v50 = vld [vmem:[%s3125_s2 + $0x74] sm:$0xf0]  ;;  %v1649_v51 = vld [vmem:[%s3125_s2 + $0xf0] sm:$0xf]  ;;  %v1478_v57 = vor.u32 %v2008_v47, %v1475_v48  ;;  %v2005_v58 = vld [vmem:[%s3123_s1 + $0xe4] sm:$0xf0] }
  0x1c   :  { %325 = vmatpush.bf16.msra.mxu0 %v1362_v16  ;;  %v2055_v52 = vld [vmem:[%s3125_s2 + $0xf4] sm:$0xf0]  ;;  %v1449_v54 = vld [vmem:[%s3123_s1 + $0xd0] sm:$0xf]  ;;  %v1586_v55 = vor.u32 %v2039_v50, %v1585_v49  ;;  %v2002_v59 = vld [vmem:[%s3123_s1 + $0xd4] sm:$0xf] }
  0x1d   :  { %339 = vmatpush.bf16.msra.mxu1 %v1366_v18  ;;  %353 = vmatpush.bf16.msra.mxu2 %v1370_v19  ;;  %v1650_v56 = vor.u32 %v2055_v52, %v1649_v51  ;;  %v1451_v60 = vld [vmem:[%s3123_s1 + $0xe8] sm:$0xf0]  ;;  %v1577_v61 = vld [vmem:[%s3125_s2 + $0x60] sm:$0xf]  ;;  %v2037_v62 = vld [vmem:[%s3125_s2 + $0x64] sm:$0xf0]  ;;  %v1450_v2 = vor.u32 %v2005_v58, %v1449_v54 }
  0x1e   :  { %367 = vmatpush.bf16.msra.mxu3 %v1374_v23  ;;  %v1641_v63 = vld [vmem:[%s3125_s2 + $0xe0] sm:$0xf]  ;;  %v1578_v0 = vor.u32 %v2037_v62, %v1577_v61  ;;  %v2053_v1 = vld [vmem:[%s3125_s2 + $0xe4] sm:$0xf0]  ;;  %v1454_v5 = vor.u32 %v2002_v59, %v1451_v60  ;;  %v1999_v6 = vld [vmem:[%s3123_s1 + $0xb4] sm:$0xf0] }
  0x1f   :  { %v1425_v3 = vld [vmem:[%s3123_s1 + $0xa0] sm:$0xf]  ;;  %v1642_v4 = vor.u32 %v2053_v1, %v1641_v63  ;;  %v1996_v7 = vld [vmem:[%s3123_s1 + $0xa4] sm:$0xf]  ;;  %v1427_v8 = vld [vmem:[%s3123_s1 + $0xb8] sm:$0xf0] }
  0x20   :  { %326 = vmatpush.bf16.msra.mxu0 %v1338_v30  ;;  %v1569_v9 = vld [vmem:[%s3125_s2 + $0x50] sm:$0xf]  ;;  %v2035_v10 = vld [vmem:[%s3125_s2 + $0x54] sm:$0xf0]  ;;  %v1426_v14 = vor.u32 %v1999_v6, %v1425_v3  ;;  %v1430_v17 = vor.u32 %v1996_v7, %v1427_v8  ;;  %v1993_v18 = vld [vmem:[%s3123_s1 + $0x84] sm:$0xf0] }
  0x21   :  { %340 = vmatpush.bf16.msra.mxu1 %v1342_v33  ;;  %354 = vmatpush.bf16.msra.mxu2 %v1346_v34  ;;  %v1633_v11 = vld [vmem:[%s3125_s2 + $0xd0] sm:$0xf]  ;;  %v1570_v12 = vor.u32 %v2035_v10, %v1569_v9  ;;  %v2051_v13 = vld [vmem:[%s3125_s2 + $0xd4] sm:$0xf0]  ;;  %v1990_v19 = vld [vmem:[%s3123_s1 + $0x74] sm:$0xf] }
  0x22   :  { %368 = vmatpush.bf16.msra.mxu3 %v1350_v35  ;;  %v1401_v15 = vld [vmem:[%s3123_s1 + $0x70] sm:$0xf]  ;;  %v1634_v16 = vor.u32 %v2051_v13, %v1633_v11  ;;  %v1403_v20 = vld [vmem:[%s3123_s1 + $0x88] sm:$0xf0]  ;;  %v1561_v21 = vld [vmem:[%s3125_s2 + $0x40] sm:$0xf] }
  0x23   :  { %327 = vmatmul.bf16.vlgmr.msra.gmra.mxu0 %v2379_v38  ;;  %v2033_v22 = vld [vmem:[%s3125_s2 + $0x44] sm:$0xf0]  ;;  %v1625_v23 = vld [vmem:[%s3125_s2 + $0xc0] sm:$0xf]  ;;  %v1402_v26 = vor.u32 %v1993_v18, %v1401_v15  ;;  %v1406_v29 = vor.u32 %v1990_v19, %v1403_v20  ;;  %v1987_v30 = vld [vmem:[%s3123_s1 + $0x54] sm:$0xf0] }
  0x24   :  { %375 = vmatpush.bf16.msrb.mxu0 %v1522_v36  ;;  %341 = vmatmul.bf16.vlgmr.msra.gmra.mxu1 %v2379_v38  ;;  %v1562_v24 = vor.u32 %v2033_v22, %v1561_v21  ;;  %v2049_v25 = vld [vmem:[%s3125_s2 + $0xc4] sm:$0xf0]  ;;  %v1377_v27 = vld [vmem:[%s3123_s1 + $0x40] sm:$0xf]  ;;  %v1984_v31 = vld [vmem:[%s3123_s1 + $0x44] sm:$0xf] }
  0x25   :  { %389 = vmatpush.bf16.msrb.mxu1 %v1526_v37  ;;  %355 = vmatmul.bf16.vlgmr.msra.gmra.mxu2 %v2379_v38  ;;  %v1626_v28 = vor.u32 %v2049_v25, %v1625_v23  ;;  %v1379_v32 = vld [vmem:[%s3123_s1 + $0x58] sm:$0xf0]  ;;  %v1553_v33 = vld [vmem:[%s3125_s2 + $0x30] sm:$0xf]  ;;  %v2031_v34 = vld [vmem:[%s3125_s2 + $0x34] sm:$0xf0]  ;;  %v1378_v39 = vor.u32 %v1987_v30, %v1377_v27 }
  0x26   :  { %369 = vmatmul.bf16.vlgmr.msra.gmra.mxu3 %v2379_v38  ;;  %991 = vmatpush.bf16.msrb.mxu2 %v1586_v55  ;;  %v1617_v35 = vld [vmem:[%s3125_s2 + $0xb0] sm:$0xf]  ;;  %v1554_v36 = vor.u32 %v2031_v34, %v1553_v33  ;;  %v2047_v37 = vld [vmem:[%s3125_s2 + $0xb4] sm:$0xf0]  ;;  %v1981_v41 = vld [vmem:[%s3123_s1 + $0x24] sm:$0xf0] }
  0x27   :  { %1005 = vmatpush.bf16.msrb.mxu3 %v1650_v56  ;;  %v1353_v40 = vld [vmem:[%s3123_s1 + $0x10] sm:$0xf]  ;;  %v1978_v42 = vld [vmem:[%s3123_s1 + $0x14] sm:$0xf]  ;;  %v1355_v45 = vld [vmem:[%s3123_s1 + $0x28] sm:$0xf0] }
  0x28   :  { %376 = vmatpush.bf16.msrb.mxu0 %v1498_v43  ;;  %v1618_v43 = vor.u32 %v2047_v37, %v1617_v35  ;;  %v1713_v46 = vld [vmem:[%s3125_s2 + $0x170] sm:$0xf]  ;;  %v2071_v47 = vld [vmem:[%s3125_s2 + $0x174] sm:$0xf0]  ;;  %v1545_v48 = vld [vmem:[%s3125_s2 + $0x20] sm:$0xf]  ;;  %v1354_v55 = vor.u32 %v1981_v41, %v1353_v40 }
  0x29   :  { %390 = vmatpush.bf16.msrb.mxu1 %v1502_v44  ;;  %v1382_v44 = vor.u32 %v1984_v31, %v1379_v32  ;;  %v2029_v49 = vld [vmem:[%s3125_s2 + $0x24] sm:$0xf0]  ;;  %v1609_v50 = vld [vmem:[%s3125_s2 + $0xa0] sm:$0xf]  ;;  %v1777_v51 = vld [vmem:[%s3125_s2 + $0x1f0] sm:$0xf]  ;;  %v1714_v58 = vor.u32 %v2071_v47, %v1713_v46 }
  0x2a   :  { %992 = vmatpush.bf16.msrb.mxu2 %v1578_v0  ;;  %v2087_v52 = vld [vmem:[%s3125_s2 + $0x1f4] sm:$0xf0]  ;;  %v2045_v54 = vld [vmem:[%s3125_s2 + $0xa4] sm:$0xf0]  ;;  %v1705_v60 = vld [vmem:[%s3125_s2 + $0x160] sm:$0xf] }
  0x2b   :  { %1006 = vmatpush.bf16.msrb.mxu3 %v1642_v4  ;;  %v1610_v56 = vor.u32 %v2045_v54, %v1609_v50  ;;  %v1778_v59 = vor.u32 %v2087_v52, %v1777_v51  ;;  %v2069_v61 = vld [vmem:[%s3125_s2 + $0x164] sm:$0xf0]  ;;  %v1769_v62 = vld [vmem:[%s3125_s2 + $0x1e0] sm:$0xf]  ;;  %v1537_v0 = vld [vmem:[%s3125_s2 + $0x10] sm:$0xf] }
  0x2c   :  { %377 = vmatpush.bf16.msrb.mxu0 %v1474_v53  ;;  %v1546_v53 = vor.u32 %v2029_v49, %v1545_v48  ;;  %v2085_v63 = vld [vmem:[%s3125_s2 + $0x1e4] sm:$0xf0]  ;;  %v2027_v1 = vld [vmem:[%s3125_s2 + $0x14] sm:$0xf0]  ;;  %v1601_v3 = vld [vmem:[%s3125_s2 + $0x90] sm:$0xf] }
  0x2d   :  { %391 = vmatpush.bf16.msrb.mxu1 %v1478_v57  ;;  %v1358_v57 = vor.u32 %v1978_v42, %v1355_v45  ;;  %v2043_v4 = vld [vmem:[%s3125_s2 + $0x94] sm:$0xf0]  ;;  %v1697_v6 = vld [vmem:[%s3125_s2 + $0x150] sm:$0xf]  ;;  %v1770_v8 = vor.u32 %v2085_v63, %v1769_v62  ;;  %v2025_v13 = vld [vmem:[%s3125_s2 + $0x4] sm:$0xf0] }
  0x2e   :  { %993 = vmatpush.bf16.msrb.mxu2 %v1570_v12  ;;  %v1602_v7 = vor.u32 %v2043_v4, %v1601_v3  ;;  %v2067_v9 = vld [vmem:[%s3125_s2 + $0x154] sm:$0xf0]  ;;  %v1761_v10 = vld [vmem:[%s3125_s2 + $0x1d0] sm:$0xf]  ;;  %v1529_v12 = vld [vmem:[%s3125_s2] sm:$0xf] }
  0x2f   :  { %1007 = vmatpush.bf16.msrb.mxu3 %v1634_v16  ;;  %v2083_v11 = vld [vmem:[%s3125_s2 + $0x1d4] sm:$0xf0]  ;;  %v1530_v15 = vor.u32 %v2025_v13, %v1529_v12  ;;  %v2041_v16 = vld [vmem:[%s3125_s2 + $0x84] sm:$0xf0]  ;;  %v1698_v19 = vor.u32 %v2067_v9, %v1697_v6  ;;  %v1753_v27 = vld [vmem:[%s3125_s2 + $0x1c0] sm:$0xf] }
  0x30   :  { %378 = vmatpush.bf16.msrb.mxu0 %v1450_v2  ;;  %v1538_v2 = vor.u32 %v2027_v1, %v1537_v0  ;;  %v2103_v18 = vld [vmem:[%s3125_s2 + $0x274] sm:$0xf0]  ;;  %v1762_v23 = vor.u32 %v2083_v11, %v1761_v10  ;;  %v2065_v25 = vld [vmem:[%s3125_s2 + $0x144] sm:$0xf0]  ;;  %v1681_v31 = vld [vmem:[%s3125_s2 + $0x130] sm:$0xf] }
  0x31   :  { %392 = vmatpush.bf16.msrb.mxu1 %v1454_v5  ;;  %v1706_v5 = vor.u32 %v2069_v61, %v1705_v60  ;;  %v2119_v22 = vld [vmem:[%s3125_s2 + $0x2f4] sm:$0xf0]  ;;  %v1745_v33 = vld [vmem:[%s3125_s2 + $0x1b0] sm:$0xf]  ;;  %v1673_v37 = vld [vmem:[%s3125_s2 + $0x120] sm:$0xf] }
  0x32   :  { %994 = vmatpush.bf16.msrb.mxu2 %v1562_v24  ;;  %v1689_v24 = vld [vmem:[%s3125_s2 + $0x140] sm:$0xf]  ;;  %v2063_v32 = vld [vmem:[%s3125_s2 + $0x134] sm:$0xf0]  ;;  %v2077_v41 = vld [vmem:[%s3125_s2 + $0x1a4] sm:$0xf0] }
  0x33   :  { %1008 = vmatpush.bf16.msrb.mxu3 %v1626_v28  ;;  %v2081_v28 = vld [vmem:[%s3125_s2 + $0x1c4] sm:$0xf0]  ;;  %v2079_v34 = vld [vmem:[%s3125_s2 + $0x1b4] sm:$0xf0]  ;;  %v1682_v35 = vor.u32 %v2063_v32, %v1681_v31  ;;  %v1737_v40 = vld [vmem:[%s3125_s2 + $0x1a0] sm:$0xf] }
  0x34   :  { %379 = vmatpush.bf16.msrb.mxu0 %v1426_v14  ;;  %v1593_v14 = vld [vmem:[%s3125_s2 + $0x80] sm:$0xf]  ;;  %v1754_v30 = vor.u32 %v2081_v28, %v1753_v27  ;;  %v2059_v45 = vld [vmem:[%s3125_s2 + $0x114] sm:$0xf0]  ;;  %v1729_v46 = vld [vmem:[%s3125_s2 + $0x190] sm:$0xf] }
  0x35   :  { %393 = vmatpush.bf16.msrb.mxu1 %v1430_v17  ;;  %v1841_v17 = vld [vmem:[%s3125_s2 + $0x270] sm:$0xf]  ;;  %v1594_v20 = vor.u32 %v2041_v16, %v1593_v14  ;;  %v2075_v47 = vld [vmem:[%s3125_s2 + $0x194] sm:$0xf0]  ;;  %v1657_v50 = vld [vmem:[%s3125_s2 + $0x100] sm:$0xf] }
  0x36   :  { %995 = vmatpush.bf16.msrb.mxu2 %v1554_v36  ;;  %v1842_v21 = vor.u32 %v2103_v18, %v1841_v17  ;;  %v1746_v36 = vor.u32 %v2079_v34, %v1745_v33  ;;  %v1730_v49 = vor.u32 %v2075_v47, %v1729_v46  ;;  %v2057_v51 = vld [vmem:[%s3125_s2 + $0x104] sm:$0xf0]  ;;  %v1721_v52 = vld [vmem:[%s3125_s2 + $0x180] sm:$0xf]  ;;  %v2038_v54 = vld [vmem:[%s3125_s2 + $0x74] sm:$0xf] }
  0x37   :  { %1009 = vmatpush.bf16.msrb.mxu3 %v1618_v43  ;;  %v1738_v43 = vor.u32 %v2077_v41, %v1737_v40  ;;  %v2036_v62 = vld [vmem:[%s3125_s2 + $0x64] sm:$0xf]  ;;  %v1579_v63 = vld [vmem:[%s3125_s2 + $0x68] sm:$0xf0]  ;;  %v2034_v4 = vld [vmem:[%s3125_s2 + $0x54] sm:$0xf] }
  0x38   :  { %380 = vmatpush.bf16.msrb.mxu0 %v1402_v26  ;;  %v2052_v0 = vld [vmem:[%s3125_s2 + $0xe4] sm:$0xf]  ;;  %v1643_v1 = vld [vmem:[%s3125_s2 + $0xe8] sm:$0xf0]  ;;  %v2050_v6 = vld [vmem:[%s3125_s2 + $0xd4] sm:$0xf] }
  0x39   :  { %394 = vmatpush.bf16.msrb.mxu1 %v1406_v29  ;;  %v1690_v29 = vor.u32 %v2065_v25, %v1689_v24  ;;  %v1646_v3 = vor.u32 %v2052_v0, %v1643_v1  ;;  %v1833_v10 = vld [vmem:[%s3125_s2 + $0x260] sm:$0xf]  ;;  %v2101_v11 = vld [vmem:[%s3125_s2 + $0x264] sm:$0xf0]  ;;  %v1563_v16 = vld [vmem:[%s3125_s2 + $0x48] sm:$0xf0] }
  0x3a   :  { %996 = vmatpush.bf16.msrb.mxu2 %v1546_v53  ;;  %v2073_v53 = vld [vmem:[%s3125_s2 + $0x184] sm:$0xf0]  ;;  %v1897_v12 = vld [vmem:[%s3125_s2 + $0x2e0] sm:$0xf]  ;;  %v1834_v13 = vor.u32 %v2101_v11, %v1833_v10  ;;  %v2115_v24 = vld [vmem:[%s3125_s2 + $0x2d4] sm:$0xf0] }
  0x3b   :  { %1010 = vmatpush.bf16.msrb.mxu3 %v1610_v56  ;;  %v2054_v56 = vld [vmem:[%s3125_s2 + $0xf4] sm:$0xf]  ;;  %v2117_v14 = vld [vmem:[%s3125_s2 + $0x2e4] sm:$0xf0]  ;;  %v1555_v28 = vld [vmem:[%s3125_s2 + $0x38] sm:$0xf0] }
  0x3c   :  { %381 = vmatpush.bf16.msrb.mxu0 %v1378_v39  ;;  %v2061_v39 = vld [vmem:[%s3125_s2 + $0x124] sm:$0xf0]  ;;  %v1898_v17 = vor.u32 %v2117_v14, %v1897_v12  ;;  %v2030_v27 = vld [vmem:[%s3125_s2 + $0x34] sm:$0xf]  ;;  %v1619_v31 = vld [vmem:[%s3125_s2 + $0xb8] sm:$0xf0] }
  0x3d   :  { %395 = vmatpush.bf16.msrb.mxu1 %v1382_v44  ;;  %v1674_v42 = vor.u32 %v2061_v39, %v1673_v37  ;;  %v1665_v44 = vld [vmem:[%s3125_s2 + $0x110] sm:$0xf]  ;;  %v1817_v33 = vld [vmem:[%s3125_s2 + $0x240] sm:$0xf]  ;;  %v2097_v34 = vld [vmem:[%s3125_s2 + $0x244] sm:$0xf0] }
  0x3e   :  { %997 = vmatpush.bf16.msrb.mxu2 %v1538_v2  ;;  %v1666_v48 = vor.u32 %v2059_v45, %v1665_v44  ;;  %v1582_v2 = vor.u32 %v2036_v62, %v1579_v63  ;;  %v2113_v37 = vld [vmem:[%s3125_s2 + $0x2c4] sm:$0xf0]  ;;  %v2028_v39 = vld [vmem:[%s3125_s2 + $0x24] sm:$0xf]  ;;  %v1547_v40 = vld [vmem:[%s3125_s2 + $0x28] sm:$0xf0] }
  0x3f   :  { %1011 = vmatpush.bf16.msrb.mxu3 %v1602_v7  ;;  %v1635_v7 = vld [vmem:[%s3125_s2 + $0xd8] sm:$0xf0]  ;;  %v1611_v44 = vld [vmem:[%s3125_s2 + $0xa8] sm:$0xf0]  ;;  %v1809_v46 = vld [vmem:[%s3125_s2 + $0x230] sm:$0xf] }
  0x40   :  { %382 = vmatpush.bf16.msrb.mxu0 %v1354_v55  ;;  %v1587_v55 = vld [vmem:[%s3125_s2 + $0x78] sm:$0xf0]  ;;  %v1638_v9 = vor.u32 %v2050_v6, %v1635_v7  ;;  %v2095_v47 = vld [vmem:[%s3125_s2 + $0x234] sm:$0xf0]  ;;  %v2109_v62 = vld [vmem:[%s3125_s2 + $0x2a4] sm:$0xf0] }
  0x41   :  { %396 = vmatpush.bf16.msrb.mxu1 %v1358_v57  ;;  %v1651_v57 = vld [vmem:[%s3125_s2 + $0xf8] sm:$0xf0]  ;;  %v1590_v60 = vor.u32 %v2038_v54, %v1587_v55  ;;  %v2042_v55 = vld [vmem:[%s3125_s2 + $0x94] sm:$0xf]  ;;  %v2024_v63 = vld [vmem:[%s3125_s2 + $0x4] sm:$0xf] }
  0x42   :  { %998 = vmatpush.bf16.msrb.mxu2 %v1530_v15  ;;  %v1654_v61 = vor.u32 %v2054_v56, %v1651_v57  ;;  %v2032_v15 = vld [vmem:[%s3125_s2 + $0x44] sm:$0xf]  ;;  %v1603_v56 = vld [vmem:[%s3125_s2 + $0x98] sm:$0xf0]  ;;  %v1531_v0 = vld [vmem:[%s3125_s2 + $0x8] sm:$0xf0] }
  0x43   :  { %383 = vmatmul.bf16.vlgmr.msrb.gmra.mxu0 %v2379_v38  ;;  %1012 = vmatpush.bf16.msrb.mxu3 %v1594_v20  ;;  %v1566_v18 = vor.u32 %v2032_v15, %v1563_v16  ;;  %v1627_v20 = vld [vmem:[%s3125_s2 + $0xc8] sm:$0xf0]  ;;  %v1606_v57 = vor.u32 %v2042_v55, %v1603_v56  ;;  %v1793_v6 = vld [vmem:[%s3125_s2 + $0x210] sm:$0xf]  ;;  %v2091_v7 = vld [vmem:[%s3125_s2 + $0x214] sm:$0xf0] }
  0x44   :  { %1019 = vmatpush.bf16.msra.mxu0 %v1714_v58  ;;  %397 = vmatmul.bf16.vlgmr.msrb.gmra.mxu1 %v2379_v38  ;;  %v1905_v38 = vld [vmem:[%s3125_s2 + $0x2f0] sm:$0xf]  ;;  %v1658_v58 = vor.u32 %v2057_v51, %v1657_v50  ;;  %v2111_v50 = vld [vmem:[%s3125_s2 + $0x2b4] sm:$0xf0]  ;;  %v2026_v51 = vld [vmem:[%s3125_s2 + $0x14] sm:$0xf] }
  0x45   :  { %1033 = vmatpush.bf16.msra.mxu1 %v1778_v59  ;;  %v1906_v26 = vor.u32 %v2119_v22, %v1905_v38  ;;  %v1722_v59 = vor.u32 %v2073_v53, %v1721_v52  ;;  %v2099_v22 = vld [vmem:[%s3125_s2 + $0x254] sm:$0xf0]  ;;  %v1539_v52 = vld [vmem:[%s3125_s2 + $0x18] sm:$0xf0]  ;;  %v1785_v12 = vld [vmem:[%s3125_s2 + $0x200] sm:$0xf] }
  0x46   :  { %1047 = vmatpush.bf16.msra.mxu2 %v1842_v21  ;;  %v1825_v21 = vld [vmem:[%s3125_s2 + $0x250] sm:$0xf]  ;;  %v1542_v54 = vor.u32 %v2026_v51, %v1539_v52  ;;  %v2107_v10 = vld [vmem:[%s3125_s2 + $0x294] sm:$0xf0]  ;;  %v1849_v14 = vld [vmem:[%s3125_s2 + $0x280] sm:$0xf] }
  0x47   :  { %1061 = vmatpush.bf16.msra.mxu3 %v1906_v26  ;;  %v1826_v25 = vor.u32 %v2099_v22, %v1825_v21  ;;  %v2105_v16 = vld [vmem:[%s3125_s2 + $0x284] sm:$0xf0]  ;;  %v1715_v21 = vld [vmem:[%s3125_s2 + $0x178] sm:$0xf0]  ;;  %v2100_v51 = vld [vmem:[%s3125_s2 + $0x264] sm:$0xf] }
  0x48   :  { %1020 = vmatpush.bf16.msra.mxu0 %v1706_v5  ;;  %v1571_v5 = vld [vmem:[%s3125_s2 + $0x58] sm:$0xf0]  ;;  %v1835_v52 = vld [vmem:[%s3125_s2 + $0x268] sm:$0xf0] }
  0x49   :  { %1034 = vmatpush.bf16.msra.mxu1 %v1770_v8  ;;  %v1574_v8 = vor.u32 %v2034_v4, %v1571_v5  ;;  %v1595_v4 = vld [vmem:[%s3125_s2 + $0x88] sm:$0xf0]  ;;  %v1779_v22 = vld [vmem:[%s3125_s2 + $0x1f8] sm:$0xf0] }
  0x4a   :  { %1048 = vmatpush.bf16.msra.mxu2 %v1834_v13  ;;  %v2089_v13 = vld [vmem:[%s3125_s2 + $0x204] sm:$0xf0]  ;;  %v1899_v56 = vld [vmem:[%s3125_s2 + $0x2e8] sm:$0xf0] }
  0x4b   :  { %1062 = vmatpush.bf16.msra.mxu3 %v1898_v17  ;;  %v1786_v15 = vor.u32 %v2089_v13, %v1785_v12  ;;  %v1850_v17 = vor.u32 %v2105_v16, %v1849_v14  ;;  %v2096_v12 = vld [vmem:[%s3125_s2 + $0x244] sm:$0xf]  ;;  %v1819_v13 = vld [vmem:[%s3125_s2 + $0x248] sm:$0xf0] }
  0x4c   :  { %1021 = vmatpush.bf16.msra.mxu0 %v1698_v19  ;;  %v2048_v19 = vld [vmem:[%s3125_s2 + $0xc4] sm:$0xf]  ;;  %v1883_v16 = vld [vmem:[%s3125_s2 + $0x2c8] sm:$0xf0] }
  0x4d   :  { %1035 = vmatpush.bf16.msra.mxu1 %v1762_v23  ;;  %v1630_v38 = vor.u32 %v2048_v19, %v1627_v20  ;;  %v1889_v23 = vld [vmem:[%s3125_s2 + $0x2d0] sm:$0xf]  ;;  %v2070_v20 = vld [vmem:[%s3125_s2 + $0x174] sm:$0xf]  ;;  %v2112_v14 = vld [vmem:[%s3125_s2 + $0x2c4] sm:$0xf] }
  0x4e   :  { %v1890_v26 = vor.u32 %v2115_v24, %v1889_v23  ;;  %1049 = vmatpush.bf16.msra.mxu2 %v1826_v25 }
  0x50   :  { %1022 = vmatpush.bf16.msra.mxu0 %v1690_v29  ;;  %v2046_v29 = vld [vmem:[%s3125_s2 + $0xb4] sm:$0xf]  ;;  %1063 = vmatpush.bf16.msra.mxu3 %v1890_v26  ;;  %v1718_v26 = vor.u32 %v2070_v20, %v1715_v21  ;;  %v2076_v20 = vld [vmem:[%s3125_s2 + $0x1a4] sm:$0xf]  ;;  %v1739_v21 = vld [vmem:[%s3125_s2 + $0x1a8] sm:$0xf0] }
  0x51   :  { %1036 = vmatpush.bf16.msra.mxu1 %v1754_v30  ;;  %v1558_v30 = vor.u32 %v2030_v27, %v1555_v28  ;;  %v1622_v32 = vor.u32 %v2046_v29, %v1619_v31  ;;  %v1707_v31 = vld [vmem:[%s3125_s2 + $0x168] sm:$0xf0] }
  0x54   :  { %1023 = vmatpush.bf16.msra.mxu0 %v1682_v35  ;;  %v1881_v35 = vld [vmem:[%s3125_s2 + $0x2c0] sm:$0xf] }
  0x55   :  { %1037 = vmatpush.bf16.msra.mxu1 %v1746_v36  ;;  %v1818_v36 = vor.u32 %v2097_v34, %v1817_v33  ;;  %v1882_v41 = vor.u32 %v2113_v37, %v1881_v35  ;;  %v2084_v33 = vld [vmem:[%s3125_s2 + $0x1e4] sm:$0xf]  ;;  %v1771_v34 = vld [vmem:[%s3125_s2 + $0x1e8] sm:$0xf0]  ;;  %v2102_v35 = vld [vmem:[%s3125_s2 + $0x274] sm:$0xf] }
  0x56   :  { %v2118_v37 = vld [vmem:[%s3125_s2 + $0x2f4] sm:$0xf] }
  0x57   :  { %1050 = vmatpush.bf16.msra.mxu2 %v1818_v36  ;;  %1064 = vmatpush.bf16.msra.mxu3 %v1882_v41  ;;  %v1843_v36 = vld [vmem:[%s3125_s2 + $0x278] sm:$0xf0]  ;;  %v1774_v41 = vor.u32 %v2084_v33, %v1771_v34  ;;  %v2074_v34 = vld [vmem:[%s3125_s2 + $0x194] sm:$0xf] }
  0x58   :  { %1024 = vmatpush.bf16.msra.mxu0 %v1674_v42  ;;  %v1550_v42 = vor.u32 %v2028_v39, %v1547_v40  ;;  %v1907_v40 = vld [vmem:[%s3125_s2 + $0x2f8] sm:$0xf0] }
  0x59   :  { %1038 = vmatpush.bf16.msra.mxu1 %v1738_v43  ;;  %v2044_v43 = vld [vmem:[%s3125_s2 + $0xa4] sm:$0xf] }
  0x5a   :  { %v1614_v45 = vor.u32 %v2044_v43, %v1611_v44  ;;  %v1699_v43 = vld [vmem:[%s3125_s2 + $0x158] sm:$0xf0]  ;;  %v2082_v44 = vld [vmem:[%s3125_s2 + $0x1d4] sm:$0xf] }
  0x5c   :  { %1025 = vmatpush.bf16.msra.mxu0 %v1666_v48  ;;  %v1873_v48 = vld [vmem:[%s3125_s2 + $0x2b0] sm:$0xf] }
  0x5d   :  { %1039 = vmatpush.bf16.msra.mxu1 %v1730_v49  ;;  %v1810_v49 = vor.u32 %v2095_v47, %v1809_v46  ;;  %v1874_v53 = vor.u32 %v2111_v50, %v1873_v48  ;;  %v1846_v47 = vor.u32 %v2102_v35, %v1843_v36  ;;  %v1910_v50 = vor.u32 %v2118_v37, %v1907_v40  ;;  %v1731_v35 = vld [vmem:[%s3125_s2 + $0x198] sm:$0xf0]  ;;  %v2092_v40 = vld [vmem:[%s3125_s2 + $0x224] sm:$0xf] }
  0x5f   :  { %1051 = vmatpush.bf16.msra.mxu2 %v1810_v49  ;;  %1065 = vmatpush.bf16.msra.mxu3 %v1874_v53  ;;  %v2116_v53 = vld [vmem:[%s3125_s2 + $0x2e4] sm:$0xf] }
  0x60   :  { %1026 = vmatpush.bf16.msra.mxu0 %v1658_v58  ;;  %v1801_v58 = vld [vmem:[%s3125_s2 + $0x220] sm:$0xf] }
  0x61   :  { %1040 = vmatpush.bf16.msra.mxu1 %v1722_v59  ;;  %v2093_v59 = vld [vmem:[%s3125_s2 + $0x224] sm:$0xf0] }
  0x64   :  { %1075 = vmatpush.bf16.msrb.mxu0 %v1590_v60  ;;  %v1865_v60 = vld [vmem:[%s3125_s2 + $0x2a0] sm:$0xf] }
  0x65   :  { %1089 = vmatpush.bf16.msrb.mxu1 %v1654_v61  ;;  %v1802_v61 = vor.u32 %v2093_v59, %v1801_v58  ;;  %v1866_v1 = vor.u32 %v2109_v62, %v1865_v60  ;;  %v2064_v58 = vld [vmem:[%s3125_s2 + $0x144] sm:$0xf]  ;;  %v1691_v59 = vld [vmem:[%s3125_s2 + $0x148] sm:$0xf0]  ;;  %v1838_v62 = vor.u32 %v2100_v51, %v1835_v52 }
  0x66   :  { %v2080_v60 = vld [vmem:[%s3125_s2 + $0x1c4] sm:$0xf] }
  0x67   :  { %1052 = vmatpush.bf16.msra.mxu2 %v1802_v61  ;;  %1066 = vmatpush.bf16.msra.mxu3 %v1866_v1  ;;  %v1755_v61 = vld [vmem:[%s3125_s2 + $0x1c8] sm:$0xf0]  ;;  %v1827_v1 = vld [vmem:[%s3125_s2 + $0x258] sm:$0xf0] }
  0x68   :  { %1076 = vmatpush.bf16.msrb.mxu0 %v1582_v2  ;;  %v1534_v2 = vor.u32 %v2024_v63, %v1531_v0  ;;  %v1902_v63 = vor.u32 %v2116_v53, %v1899_v56  ;;  %v2098_v0 = vld [vmem:[%s3125_s2 + $0x254] sm:$0xf] }
  0x69   :  { %1090 = vmatpush.bf16.msrb.mxu1 %v1646_v3  ;;  %v2040_v3 = vld [vmem:[%s3125_s2 + $0x84] sm:$0xf]  ;;  %v2090_v53 = vld [vmem:[%s3125_s2 + $0x214] sm:$0xf] }
  0x6a   :  { %v1598_v5 = vor.u32 %v2040_v3, %v1595_v4  ;;  %v1694_v3 = vor.u32 %v2064_v58, %v1691_v59  ;;  %v1891_v4 = vld [vmem:[%s3125_s2 + $0x2d8] sm:$0xf0]  ;;  %v2106_v56 = vld [vmem:[%s3125_s2 + $0x294] sm:$0xf] }
  0x6c   :  { %1077 = vmatpush.bf16.msrb.mxu0 %v1574_v8  ;;  %v1857_v8 = vld [vmem:[%s3125_s2 + $0x290] sm:$0xf] }
  0x6d   :  { %1091 = vmatpush.bf16.msrb.mxu1 %v1638_v9  ;;  %v1794_v9 = vor.u32 %v2091_v7, %v1793_v6  ;;  %v1858_v11 = vor.u32 %v2107_v10, %v1857_v8  ;;  %v2062_v6 = vld [vmem:[%s3125_s2 + $0x134] sm:$0xf]  ;;  %v1683_v7 = vld [vmem:[%s3125_s2 + $0x138] sm:$0xf0]  ;;  %v1830_v10 = vor.u32 %v2098_v0, %v1827_v1  ;;  %v2088_v0 = vld [vmem:[%s3125_s2 + $0x204] sm:$0xf] }
  0x6e   :  { %v2078_v8 = vld [vmem:[%s3125_s2 + $0x1b4] sm:$0xf]  ;;  %v1787_v1 = vld [vmem:[%s3125_s2 + $0x208] sm:$0xf0] }
  0x6f   :  { %1053 = vmatpush.bf16.msra.mxu2 %v1794_v9  ;;  %1067 = vmatpush.bf16.msra.mxu3 %v1858_v11  ;;  %v1747_v9 = vld [vmem:[%s3125_s2 + $0x1b8] sm:$0xf0] }
  0x70   :  { %1078 = vmatpush.bf16.msrb.mxu0 %v1566_v18 }
  0x71   :  { %1092 = vmatpush.bf16.msrb.mxu1 %v1630_v38  ;;  %v2086_v38 = vld [vmem:[%s3125_s2 + $0x1f4] sm:$0xf] }
  0x72   :  { %v1782_v29 = vor.u32 %v2086_v38, %v1779_v22  ;;  %v1822_v38 = vor.u32 %v2096_v12, %v1819_v13  ;;  %v1886_v22 = vor.u32 %v2112_v14, %v1883_v16  ;;  %v2134_v12 = vld [vmem:[%s3127_s4 + $0x70] sm:$0xff]  ;;  %v2133_v16 = vld [vmem:[%s3127_s4 + $0x68] sm:$0xff] }
  0x73   :  { %1054 = vmatpush.bf16.msra.mxu2 %v1786_v15  ;;  %1068 = vmatpush.bf16.msra.mxu3 %v1850_v17  ;;  %v1686_v15 = vor.u32 %v2062_v6, %v1683_v7  ;;  %v1750_v17 = vor.u32 %v2078_v8, %v1747_v9  ;;  %v2127_v6 = vld [vmem:[%s3127_s4 + $0x38] sm:$0xff]  ;;  %v2126_v7 = vld [vmem:[%s3127_s4 + $0x30] sm:$0xff]  ;;  %v2125_v8 = vld [vmem:[%s3127_s4 + $0x28] sm:$0xff] }
  0x74   :  { %1079 = vmatpush.bf16.msrb.mxu0 %v1558_v30  ;;  %v2068_v30 = vld [vmem:[%s3125_s2 + $0x164] sm:$0xf]  ;;  %v2122_v9 = vld [vmem:[%s3127_s4 + $0x10] sm:$0xff] }
  0x75   :  { %1093 = vmatpush.bf16.msrb.mxu1 %v1622_v32  ;;  %v1710_v39 = vor.u32 %v2068_v30, %v1707_v31  ;;  %v2058_v30 = vld [vmem:[%s3125_s2 + $0x114] sm:$0xf]  ;;  %v1667_v31 = vld [vmem:[%s3125_s2 + $0x118] sm:$0xf0] }
  0x78   :  { %1080 = vmatpush.bf16.msrb.mxu0 %v1550_v42  ;;  %v2066_v42 = vld [vmem:[%s3125_s2 + $0x154] sm:$0xf] }
  0x79   :  { %1094 = vmatpush.bf16.msrb.mxu1 %v1614_v45  ;;  %v1763_v45 = vld [vmem:[%s3125_s2 + $0x1d8] sm:$0xf0] }
  0x7c   :  { %1081 = vmatpush.bf16.msrb.mxu0 %v1542_v54  ;;  %v1702_v54 = vor.u32 %v2066_v42, %v1699_v43  ;;  %v2108_v42 = vld [vmem:[%s3125_s2 + $0x2a4] sm:$0xf]  ;;  %v1670_v43 = vor.u32 %v2058_v30, %v1667_v31  ;;  %v2129_v31 = vld [vmem:[%s3127_s4 + $0x48] sm:$0xff] }
  0x7d   :  { %1095 = vmatpush.bf16.msrb.mxu1 %v1606_v57  ;;  %v1766_v57 = vor.u32 %v2082_v44, %v1763_v45  ;;  %v1867_v44 = vld [vmem:[%s3125_s2 + $0x2a8] sm:$0xf0]  ;;  %v1734_v45 = vor.u32 %v2074_v34, %v1731_v35 }
  0x7e   :  { %v1870_v52 = vor.u32 %v2108_v42, %v1867_v44 }
  0x80   :  { %1082 = vmatpush.bf16.msrb.mxu0 %v1534_v2  ;;  %v2114_v2 = vld [vmem:[%s3125_s2 + $0x2d4] sm:$0xf] }
  0x81   :  { %1096 = vmatpush.bf16.msrb.mxu1 %v1598_v5  ;;  %v1758_v5 = vor.u32 %v2080_v60, %v1755_v61  ;;  %v1894_v11 = vor.u32 %v2114_v2, %v1891_v4  ;;  %v2104_v2 = vld [vmem:[%s3125_s2 + $0x284] sm:$0xf]  ;;  %v1790_v4 = vor.u32 %v2088_v0, %v1787_v1 }
  0xa0   :  { %v328_v18 = vpop.f32.mrf.mxu0 }
  0xa1   :  { %v342_v19 = vpop.f32.mrf.mxu1 }
  0xa8   :  { %v356_v23 = vpop.f32.mrf.mxu2  ;;  %v330_v25 = vpop.f32.mrf.mxu0 }
  0xa9   :  { %v370_v24 = vpop.f32.mrf.mxu3  ;;  %v2867_v27 = vpack.c.bf16 %v330_v25, %v328_v18  ;;  %v344_v28 = vpop.f32.mrf.mxu1  ;;  %v2060_v18 = vld [vmem:[%s3125_s2 + $0x124] sm:$0xf]  ;;  %v2110_v25 = vld [vmem:[%s3125_s2 + $0x2b4] sm:$0xf] }
  0xaa   :  { %v2875_v32 = vpack.c.bf16 %v344_v28, %v342_v19  ;;  %v1675_v19 = vld [vmem:[%s3125_s2 + $0x128] sm:$0xf0]  ;;  %v1875_v28 = vld [vmem:[%s3125_s2 + $0x2b8] sm:$0xf0] }
  0xab   :  { %999 = vmatmul.bf16.vlgmr.msrb.gmra.mxu2 %v2867_v27 }
  0xac   :  { %1013 = vmatmul.bf16.vlgmr.msrb.gmra.mxu3 %v2875_v32  ;;  %1103 = vmatpush.bf16.msrb.mxu2 %v1718_v26  ;;  %v1678_v26 = vor.u32 %v2060_v18, %v1675_v19  ;;  %v505_v19 = vld [vmem:[%s3128_s3] sm:$0x3] }
  0xad   :  { %1117 = vmatpush.bf16.msrb.mxu3 %v1782_v29  ;;  %v1742_v29 = vor.u32 %v2076_v20, %v1739_v21  ;;  %v2132_v20 = vld [vmem:[%s3127_s4 + $0x60] sm:$0xff]  ;;  %v507_v21 = vperm.slane %v505_v19, 0 }
  0xb0   :  { %v358_v46 = vpop.f32.mrf.mxu2  ;;  %1104 = vmatpush.bf16.msrb.mxu2 %v1710_v39  ;;  %v1878_v39 = vor.u32 %v2110_v25, %v1875_v28  ;;  %v2130_v28 = vld [vmem:[%s3127_s4 + $0x50] sm:$0xff] }
  0xb1   :  { %v2909_v48 = vpack.c.bf16 %v358_v46, %v356_v23  ;;  %v372_v49 = vpop.f32.mrf.mxu3  ;;  %1118 = vmatpush.bf16.msrb.mxu3 %v1774_v41  ;;  %v2094_v23 = vld [vmem:[%s3125_s2 + $0x234] sm:$0xf]  ;;  %v1803_v41 = vld [vmem:[%s3125_s2 + $0x228] sm:$0xf0]  ;;  %v2056_v46 = vld [vmem:[%s3125_s2 + $0x104] sm:$0xf] }
  0xb2   :  { %v2920_v55 = vpack.c.bf16 %v372_v49, %v370_v24  ;;  %v1811_v24 = vld [vmem:[%s3125_s2 + $0x238] sm:$0xf0]  ;;  %v2072_v49 = vld [vmem:[%s3125_s2 + $0x184] sm:$0xf]  ;;  %v1806_v51 = vor.u32 %v2092_v40, %v1803_v41 }
  0xb3   :  { %1027 = vmatmul.bf16.vlgmr.msra.gmra.mxu0 %v2909_v48  ;;  %v1814_v37 = vor.u32 %v2094_v23, %v1811_v24  ;;  %v2128_v40 = vld [vmem:[%s3127_s4 + $0x40] sm:$0xff] }
  0xb4   :  { %1041 = vmatmul.bf16.vlgmr.msra.gmra.mxu1 %v2920_v55  ;;  %1131 = vmatpush.bf16.msra.mxu0 %v1846_v47  ;;  %v1659_v47 = vld [vmem:[%s3125_s2 + $0x108] sm:$0xf0] }
  0xb5   :  { %1145 = vmatpush.bf16.msra.mxu1 %v1910_v50  ;;  %1105 = vmatpush.bf16.msrb.mxu2 %v1702_v54  ;;  %v1723_v50 = vld [vmem:[%s3125_s2 + $0x188] sm:$0xf0]  ;;  %v1662_v54 = vor.u32 %v2056_v46, %v1659_v47 }
  0xb6   :  { %1119 = vmatpush.bf16.msrb.mxu3 %v1766_v57  ;;  %v1726_v57 = vor.u32 %v2072_v49, %v1723_v50 }
  0xb8   :  { %1132 = vmatpush.bf16.msra.mxu0 %v1838_v62 }
  0xb9   :  { %1146 = vmatpush.bf16.msra.mxu1 %v1902_v63  ;;  %1106 = vmatpush.bf16.msrb.mxu2 %v1694_v3  ;;  %v1851_v3 = vld [vmem:[%s3125_s2 + $0x288] sm:$0xf0] }
  0xba   :  { %1120 = vmatpush.bf16.msrb.mxu3 %v1758_v5  ;;  %v1854_v5 = vor.u32 %v2104_v2, %v1851_v3 }
  0xbc   :  { %1133 = vmatpush.bf16.msra.mxu0 %v1830_v10  ;;  %v2135_v10 = vld [vmem:[%s3127_s4 + $0x78] sm:$0xff] }
  0xbd   :  { %1147 = vmatpush.bf16.msra.mxu1 %v1894_v11  ;;  %1107 = vmatpush.bf16.msrb.mxu2 %v1686_v15  ;;  %v2121_v11 = vld [vmem:[%s3127_s4 + $0x8] sm:$0xff]  ;;  %v2120_v15 = vld [vmem:[%s3127_s4] sm:$0xff] }
  0xbe   :  { %1121 = vmatpush.bf16.msrb.mxu3 %v1750_v17 }
  0xc0   :  { %v384_v33 = vpop.f32.mrf.mxu0  ;;  %1134 = vmatpush.bf16.msra.mxu0 %v1822_v38 }
  0xc1   :  { %v398_v36 = vpop.f32.mrf.mxu1  ;;  %1148 = vmatpush.bf16.msra.mxu1 %v1886_v22  ;;  %1108 = vmatpush.bf16.msrb.mxu2 %v1678_v26  ;;  %v2131_v22 = vld [vmem:[%s3127_s4 + $0x58] sm:$0xff] }
  0xc2   :  { %1122 = vmatpush.bf16.msrb.mxu3 %v1742_v29 }
  0xc3   :  { %1083 = vmatmul.bf16.vlgmr.msrb.gmra.mxu0 %v2867_v27  ;;  %v1795_v27 = vld [vmem:[%s3125_s2 + $0x218] sm:$0xf0] }
  0xc4   :  { %1097 = vmatmul.bf16.vlgmr.msrb.gmra.mxu1 %v2875_v32  ;;  %1135 = vmatpush.bf16.msra.mxu0 %v1814_v37  ;;  %v1859_v32 = vld [vmem:[%s3125_s2 + $0x298] sm:$0xf0]  ;;  %v1798_v61 = vor.u32 %v2090_v53, %v1795_v27 }
  0xc5   :  { %1149 = vmatpush.bf16.msra.mxu1 %v1878_v39  ;;  %1109 = vmatpush.bf16.msrb.mxu2 %v1670_v43  ;;  %v1862_v63 = vor.u32 %v2106_v56, %v1859_v32 }
  0xc6   :  { %1123 = vmatpush.bf16.msrb.mxu3 %v1734_v45  ;;  %v508_v45 = vperm.slane %v505_v19, 1 }
  0xc8   :  { %v386_v58 = vpop.f32.mrf.mxu0  ;;  %1136 = vmatpush.bf16.msra.mxu0 %v1806_v51 }
  0xc9   :  { %v407_v59 = vpack.c.bf16 %v386_v58, %v384_v33  ;;  %v400_v60 = vpop.f32.mrf.mxu1  ;;  %1150 = vmatpush.bf16.msra.mxu1 %v1870_v52  ;;  %1110 = vmatpush.bf16.msrb.mxu2 %v1662_v54 }
  0xca   :  { %v408_v62 = vpack.c.bf16 %v400_v60, %v398_v36  ;;  %1124 = vmatpush.bf16.msrb.mxu3 %v1726_v57 }
  0xcb   :  { %1055 = vmatmul.bf16.vlgmr.msra.gmra.mxu2 %v407_v59 }
  0xcc   :  { %1069 = vmatmul.bf16.vlgmr.msra.gmra.mxu3 %v408_v62  ;;  %1137 = vmatpush.bf16.msra.mxu0 %v1798_v61 }
  0xcd   :  { %1151 = vmatpush.bf16.msra.mxu1 %v1862_v63  ;;  %1297 = vmatpush.bf16.msra.mxu2 %v2127_v6 }
  0xce   :  { %1311 = vmatpush.bf16.msra.mxu3 %v2135_v10 }
  0xd0   :  { %1138 = vmatpush.bf16.msra.mxu0 %v1790_v4 }
  0xd1   :  { %1152 = vmatpush.bf16.msra.mxu1 %v1854_v5  ;;  %1298 = vmatpush.bf16.msra.mxu2 %v2126_v7 }
  0xd2   :  { %1312 = vmatpush.bf16.msra.mxu3 %v2134_v12 }
  0xd3   :  { %1139 = vmatmul.bf16.vlgmr.msra.gmra.mxu0 %v407_v59 }
  0xd4   :  { %1153 = vmatmul.bf16.vlgmr.msra.gmra.mxu1 %v408_v62 }
  0xd5   :  { %1299 = vmatpush.bf16.msra.mxu2 %v2125_v8 }
  0xd6   :  { %1313 = vmatpush.bf16.msra.mxu3 %v2133_v16 }
  0xda   :  { %1314 = vmatpush.bf16.msra.mxu3 %v2132_v20 }
  0xdb   :  { %1111 = vmatmul.bf16.vlgmr.msrb.gmra.mxu2 %v2909_v48  ;;  %v2124_v48 = vld [vmem:[%s3127_s4 + $0x20] sm:$0xff] }
  0xdc   :  { %1125 = vmatmul.bf16.vlgmr.msrb.gmra.mxu3 %v2920_v55  ;;  %1300 = vmatpush.bf16.msra.mxu2 %v2124_v48  ;;  %v2123_v55 = vld [vmem:[%s3127_s4 + $0x18] sm:$0xff] }
  0xde   :  { %1315 = vmatpush.bf16.msra.mxu3 %v2131_v22 }
  0xe0   :  { %1301 = vmatpush.bf16.msra.mxu2 %v2123_v55 }
  0xe2   :  { %1316 = vmatpush.bf16.msra.mxu3 %v2130_v28 }
  0xe4   :  { %1302 = vmatpush.bf16.msra.mxu2 %v2122_v9 }
  0xe6   :  { %1317 = vmatpush.bf16.msra.mxu3 %v2129_v31 }
  0xe8   :  { %1303 = vmatpush.bf16.msra.mxu2 %v2121_v11 }
  0xea   :  { %1318 = vmatpush.bf16.msra.mxu3 %v2128_v40 }
  0xec   :  { %1304 = vmatpush.bf16.msra.mxu2 %v2120_v15 }
 0x12e   :  { %v1000_v17 = vpop.f32.mrf.mxu2 }
 0x12f   :  { %v1014_v18 = vpop.f32.mrf.mxu3  ;;  %v1001_v24 = vadd.f32 %v1000_v17, %v507_v21 }
 0x130   :  { %v1028_v13 = vpop.f32.mrf.mxu0 }
 0x131   :  { %v1042_v14 = vpop.f32.mrf.mxu1  ;;  %v1015_v29 = vadd.f32 %v1014_v18, %v1001_v24 }
 0x133   :  { %v1029_v34 = vadd.f32 %v1028_v13, %v1015_v29 }
 0x135   :  { %v1043_v41 = vadd.f32 %v1042_v14, %v1029_v34  ;;  %v2136_v14 = vld [vmem:[%s3126_s5] ss:$0 sm:$0xff] }
 0x136   :  { %v1002_v25 = vpop.f32.mrf.mxu2 }
 0x137   :  { %v1016_v26 = vpop.f32.mrf.mxu3  ;;  %v1003_v30 = vadd.f32 %v1002_v25, %v507_v21 }
 0x138   :  { %v1030_v38 = vpop.f32.mrf.mxu0 }
 0x139   :  { %v1044_v23 = vpop.f32.mrf.mxu1  ;;  %v1017_v35 = vadd.f32 %v1016_v26, %v1003_v30 }
 0x13b   :  { %v1031_v42 = vadd.f32 %v1030_v38, %v1017_v35 }
 0x13d   :  { %v1045_v44 = vadd.f32 %v1044_v23, %v1031_v42 }
 0x140   :  { %v1084_v33 = vpop.f32.mrf.mxu0 }
 0x141   :  { %v1098_v36 = vpop.f32.mrf.mxu1  ;;  %v1085_v53 = vadd.f32 %v1084_v33, %v508_v45 }
 0x143   :  { %v1099_v32 = vadd.f32 %v1098_v36, %v1085_v53 }
 0x148   :  { %v1086_v46 = vpop.f32.mrf.mxu0 }
 0x149   :  { %v1100_v52 = vpop.f32.mrf.mxu1  ;;  %v1087_v62 = vadd.f32 %v1086_v46, %v508_v45 }
 0x14b   :  { %v1101_v1 = vadd.f32 %v1100_v52, %v1087_v62 }
 0x14e   :  { %v1056_v37 = vpop.f32.mrf.mxu2 }
 0x14f   :  { %v1070_v39 = vpop.f32.mrf.mxu3  ;;  %v1057_v43 = vadd.f32 %v1056_v37, %v1043_v41 }
 0x150   :  { %v1140_v61 = vpop.f32.mrf.mxu0 }
 0x151   :  { %v1071_v49 = vadd.f32 %v1070_v39, %v1057_v43  ;;  %v1154_v63 = vpop.f32.mrf.mxu1 }
 0x153   :  { %v1159_v54 = vmax.f32 %v1071_v49, 0.0 }
 0x156   :  { %v1058_v47 = vpop.f32.mrf.mxu2 }
 0x157   :  { %v1059_v50 = vadd.f32 %v1058_v47, %v1045_v44  ;;  %v1072_v51 = vpop.f32.mrf.mxu3 }
 0x158   :  { %v1142_v7 = vpop.f32.mrf.mxu0 }
 0x159   :  { %v1073_v27 = vadd.f32 %v1072_v51, %v1059_v50  ;;  %v1156_v55 = vpop.f32.mrf.mxu1 }
 0x15b   :  { %v1161_v56 = vmax.f32 %v1073_v27, 0.0 }
 0x15d   :  { %v1163_v57 = vpack.c.bf16 %v1161_v56, %v1159_v54 }
 0x15e   :  { %v1112_v58 = vpop.f32.mrf.mxu2 }
 0x15f   :  { %v1113_v59 = vadd.f32 %v1112_v58, %v1099_v32  ;;  %v1126_v60 = vpop.f32.mrf.mxu3  ;;  %1305 = vmatmul.bf16.vlgmr.msra.gmra.mxu2 %v1163_v57 }
 0x161   :  { %v1127_v0 = vadd.f32 %v1126_v60, %v1113_v59 }
 0x163   :  { %v1141_v3 = vadd.f32 %v1140_v61, %v1127_v0 }
 0x165   :  { %v1155_v8 = vadd.f32 %v1154_v63, %v1141_v3 }
 0x166   :  { %v1114_v2 = vpop.f32.mrf.mxu2 }
 0x167   :  { %v1115_v4 = vadd.f32 %v1114_v2, %v1101_v1  ;;  %v1128_v5 = vpop.f32.mrf.mxu3  ;;  %v1160_v10 = vmax.f32 %v1155_v8, 0.0 }
 0x169   :  { %v1129_v6 = vadd.f32 %v1128_v5, %v1115_v4 }
 0x16b   :  { %v1143_v48 = vadd.f32 %v1142_v7, %v1129_v6 }
 0x16d   :  { %v1157_v9 = vadd.f32 %v1156_v55, %v1143_v48 }
 0x16f   :  { %v1162_v11 = vmax.f32 %v1157_v9, 0.0 }
 0x171   :  { %v1164_v12 = vpack.c.bf16 %v1162_v11, %v1160_v10 }
 0x173   :  { %1319 = vmatmul.bf16.vlgmr.msra.gmra.mxu3 %v1164_v12 }
 0x1e2   :  { %v1306_v13 = vpop.f32.mrf.mxu2 }
 0x1e3   :  { %v1307_v15 = vadd.f32 %v2136_v14, %v1306_v13 }
 0x1ea   :  { %v1308_v18 = vpop.f32.mrf.mxu2 }
 0x1eb   :  { %v1309_v19 = vadd.f32 %v2136_v14, %v1308_v18 }
 0x1f6   :  { %v1320_v16 = vpop.f32.mrf.mxu3 }
 0x1f7   :  { %v1321_v17 = vadd.f32 %v1320_v16, %v1307_v15 }
 0x1f9   :  { %1325 = vst [vmem:[%s3129_s6] sm:$0xff] %v1321_v17 }
 0x1fe   :  { %v1322_v20 = vpop.f32.mrf.mxu3 }
 0x1ff   :  { %v1323_v21 = vadd.f32 %v1322_v20, %v1309_v19 }
 0x201   :  { %1326 = vst [vmem:[%s3129_s6 + $0x8] sm:$0xff] %v1323_v21 }

</bundles_post_ra>
